<compile_context>
chip_gen: v7x
topology: tpu7x:2x2x1
jax: 0.10.0
libtpu: 0.0.40
codegen_flags: <defaults>
</compile_context>

<pallas_src>
import functools
import math

import jax
import jax.numpy as jnp
from jax import lax
from jax.experimental import pallas as pl
from jax.experimental.pallas import tpu as pltpu


def _round_up(v, m):
    return (v + m - 1) // m * m


def _quantize_f32(v, qmin, qmax, inv_step, step):
    # DFXP fixed-point quantization: snap to grid of `step`, clamp to [qmin, qmax].
    return jnp.clip(jnp.round(v * inv_step), qmin, qmax) * step


def _default_operand_dtype():
    """MXU operand dtype for quantized (bits<=8) operands, per TPU generation."""
    try:
        kind = jax.devices()[0].device_kind.lower()
    except Exception:
        return jnp.bfloat16
    if ("v5" in kind) or ("v6" in kind):
        return jnp.int8      # v5*/v6* MXU: int8 ~2x bf16 throughput, 2x fewer HBM bytes
    return jnp.bfloat16      # v7x (and unknown): bf16/fp8-only MXU -> exact bf16 path


# --------------------------------------------------------------------------- #
# One-shot elementwise quantize + cast pre-pass (hoists the VALU quantize chain
# out of the matmul and narrows the operands streamed by the matmul).
# --------------------------------------------------------------------------- #
def _quantize_cast_kernel(x_ref, o_ref, *, qmin, qmax, inv_step, step):
    v = x_ref[...].astype(jnp.float32)
    q = jnp.clip(jnp.round(v * inv_step), qmin, qmax)
    if jnp.issubdtype(o_ref.dtype, jnp.integer):
        # Raw integer levels q (|q| <= 128 for bits<=8): exact in int8.
        o_ref[...] = q.astype(jnp.int32).astype(o_ref.dtype)
    else:
        # Dequantized levels q*step: exact in bf16 for bits<=8, power-of-two step.
        o_ref[...] = (q * step).astype(o_ref.dtype)


def _quantize_cast_2d(x, *, out_dtype, qmin, qmax, inv_step, step, tr, tc):
    rows, cols = x.shape
    assert rows % tr == 0 and cols % tc == 0, (x.shape, tr, tc)
    kern = functools.partial(
        _quantize_cast_kernel, qmin=qmin, qmax=qmax, inv_step=inv_step, step=step
    )
    return pl.pallas_call(
        kern,
        out_shape=jax.ShapeDtypeStruct((rows, cols), out_dtype),
        grid=(rows // tr, cols // tc),
        in_specs=[pl.BlockSpec((tr, tc), lambda i, j: (i, j))],
        out_specs=pl.BlockSpec((tr, tc), lambda i, j: (i, j)),
        compiler_params=pltpu.CompilerParams(
            dimension_semantics=("parallel", "parallel")
        ),
    )(x)


# --------------------------------------------------------------------------- #
# Matmul (+ bias, + dequant scale for int8) kernel.  Operands are already
# quantized/cast; the inner loop is pure MXU + DMA.
# --------------------------------------------------------------------------- #
def _linear_q_matmul_kernel(x_ref, w_ref, b_ref, o_ref, *scratch, int8_path,
                            quantize_bias, qmin, qmax, inv_step, step):
    # If no scratch was allocated, accumulate directly into the (f32) output tile.
    acc_ref = scratch[0] if scratch else o_ref
    k = pl.program_id(2)

    @pl.when(k == 0)
    def _init():
        acc_ref[...] = jnp.zeros_like(acc_ref)

    acc_ref[...] += lax.dot_general(
        x_ref[...], w_ref[...],
        dimension_numbers=(((1,), (0,)), ((), ())),
        preferred_element_type=jnp.int32 if int8_path else jnp.float32,
    )

    @pl.when(k == pl.num_programs(2) - 1)
    def _finalize():
        acc = acc_ref[...].astype(jnp.float32)
        if int8_path:
            acc = acc * (step * step)          # dequantize: (q_x.q_w) * step^2
        b = b_ref[...].astype(jnp.float32)
        if quantize_bias:
            b = _quantize_f32(b, qmin, qmax, inv_step, step)
        o_ref[...] = (acc + b).astype(o_ref.dtype)


def linear_q(x, weight, bias=None, *, bits=8, step=2.0 ** (-5),
             tm=512, tn=1024, tk=512, operand_dtype=None):
    """Quantized linear: quantize(x) @ quantize(W).T + quantize(b)."""
    M, K = x.shape
    N, K2 = weight.shape
    assert K == K2, (K, K2)
    out_dtype = x.dtype
    if bias is None:
        bias = jnp.zeros((N,), jnp.float32)

    quantize = bits != 32            # bits == 32 => identity quantizers in the module.
    qmin = -2.0 ** (bits - 1)
    qmax = 2.0 ** (bits - 1) - 1
    inv_step = 1.0 / step
    pow2_step = math.frexp(step)[0] == 0.5

    # Pick the MXU operand dtype: exact narrow path only for bits<=8, pow2 step.
    if (not quantize) or bits > 8 or not pow2_step:
        compute_dtype = jnp.dtype(jnp.float32)
    else:
        compute_dtype = jnp.dtype(
            operand_dtype if operand_dtype is not None else _default_operand_dtype()
        )
        if compute_dtype == jnp.dtype(jnp.int8):
            # int32 accumulation overflow guard: each product <= 2^(2*bits-2).
            if K * (2.0 ** (2 * bits - 2)) >= 2.0 ** 31:
                compute_dtype = jnp.dtype(jnp.bfloat16)
    int8_path = compute_dtype == jnp.dtype(jnp.int8)

    # Tile sizes: lane dims multiples of 128; M aligned to the operand dtype's
    # native sublane tile (32 for int8, 16 for bf16, 8 for f32).
    m_align = 32 if int8_path else (16 if compute_dtype == jnp.dtype(jnp.bfloat16) else 8)
    tm = _round_up(min(tm, _round_up(M, m_align)), m_align)
    tn = min(tn, _round_up(N, 128))
    tk = min(tk, _round_up(K, 128))
    m_pad = _round_up(M, tm)
    n_pad = _round_up(N, tn)
    k_pad = _round_up(K, tk)
    grid = (m_pad // tm, n_pad // tn, k_pad // tk)

    # Zero padding is semantically safe: quantize(0) == 0 and contributes 0 to
    # the contraction; padded rows/cols are sliced off below.  jnp.pad is a
    # no-op when shapes are already tile-aligned.
    x_p = x.astype(jnp.float32)
    if (m_pad, k_pad) != (M, K):
        x_p = jnp.pad(x_p, ((0, m_pad - M), (0, k_pad - K)))
    # Stream the weight as (K, N) so the MXU contraction is the standard form.
    w_t = weight.astype(jnp.float32).T
    if (k_pad, n_pad) != (K, N):
        w_t = jnp.pad(w_t, ((0, k_pad - K), (0, n_pad - N)))
    b_p = bias.astype(jnp.float32).reshape(1, N)
    if n_pad != N:
        b_p = jnp.pad(b_p, ((0, 0), (0, n_pad - N)))

    if quantize:
        # Hoisted one-shot quantize passes -> narrow MXU operands.
        x_q = _quantize_cast_2d(x_p, out_dtype=compute_dtype, qmin=qmin, qmax=qmax,
                                inv_step=inv_step, step=step, tr=tm, tc=tk)
        w_q = _quantize_cast_2d(w_t, out_dtype=compute_dtype, qmin=qmin, qmax=qmax,
                                inv_step=inv_step, step=step, tr=tk, tc=tn)
    else:
        x_q, w_q = x_p, w_t

    # Accumulate directly into the f32 output tile when possible; int8 keeps an
    # exact int32 scratch accumulator.
    direct_acc = (not int8_path) and jnp.dtype(out_dtype) == jnp.dtype(jnp.float32)
    acc_dtype = jnp.int32 if int8_path else jnp.float32
    scratch_shapes = [] if direct_acc else [pltpu.VMEM((tm, tn), acc_dtype)]

    isz = compute_dtype.itemsize
    vmem_est = (2 * (tm * tk + tk * tn) * isz                 # double-buffered operands
                + 2 * tm * tn * jnp.dtype(out_dtype).itemsize # double-buffered output
                + (0 if direct_acc else tm * tn * 4)          # accumulator
                + 2 * tn * 4)                                 # bias
    # Explicit scoped-VMEM limit (v5e default is only 16 MiB); capped safely
    # below v7x's 64 MiB physical VMEM.
    vmem_limit = int(min(max(2 * vmem_est, 32 * 1024 * 1024), 48 * 1024 * 1024))

    kernel = functools.partial(
        _linear_q_matmul_kernel,
        int8_path=int8_path, quantize_bias=quantize,
        qmin=qmin, qmax=qmax, inv_step=inv_step, step=step,
    )

    out_p = pl.pallas_call(
        kernel,
        out_shape=jax.ShapeDtypeStruct((m_pad, n_pad), out_dtype),
        grid_spec=pltpu.PrefetchScalarGridSpec(
            num_scalar_prefetch=0,
            grid=grid,
            in_specs=[
                pl.BlockSpec((tm, tk), lambda i, j, k: (i, k)),   # x tile
                pl.BlockSpec((tk, tn), lambda i, j, k: (k, j)),   # weight (K,N) tile
                pl.BlockSpec((1, tn), lambda i, j, k: (0, j)),    # bias tile
            ],
            out_specs=pl.BlockSpec((tm, tn), lambda i, j, k: (i, j)),
            scratch_shapes=scratch_shapes,
        ),
        compiler_params=pltpu.CompilerParams(
            dimension_semantics=("parallel", "parallel", "arbitrary"),
            vmem_limit_bytes=vmem_limit,
        ),
    )(x_q, w_q, b_p)

    return out_p[:M, :N]


def reference_linear_q(x, weight, bias, *, bits=8, step=2.0 ** (-5)):
    x = x.astype(jnp.float32)
    w = weight.astype(jnp.float32)
    b = bias.astype(jnp.float32)
    if bits != 32:
        qmin = -2.0 ** (bits - 1)
        qmax = 2.0 ** (bits - 1) - 1
        x = _quantize_f32(x, qmin, qmax, 1.0 / step, step)
        w = _quantize_f32(w, qmin, qmax, 1.0 / step, step)
        b = _quantize_f32(b, qmin, qmax, 1.0 / step, step)
    out = lax.dot_general(
        x, w, dimension_numbers=(((1,), (1,)), ((), ())),
        precision=jax.lax.Precision.HIGHEST, preferred_element_type=jnp.float32)
    return out + b


if __name__ == "__main__":
    # ---- Test 1: tiny single-tile problem, Linear_q-style init (bits=8).
    batch, in_features, out_features = 8, 32, 16
    kx, kw, _ = jax.random.split(jax.random.PRNGKey(0), 3)
    bound = (6.0 / (in_features + out_features)) ** 0.5
    w1 = jax.random.uniform(kw, (out_features, in_features), jnp.float32, -bound, bound)
    b1 = jnp.zeros((out_features,), jnp.float32)
    x1 = jax.random.normal(kx, (batch, in_features), jnp.float32)

    out1 = jax.block_until_ready(linear_q(x1, w1, b1, bits=8))
    ref1 = reference_linear_q(x1, w1, b1, bits=8)
    assert out1.shape == (batch, out_features)
    err1 = float(jnp.max(jnp.abs(out1 - ref1)))
    assert err1 < 2e-3, err1

    # ---- Test 2: ragged multi-K-tile problem (padding, K accumulation, epilogue
    #      bias, hoisted quantize pre-passes).  Auto operand dtype (int8 on
    #      v5*/v6*, bf16 elsewhere) plus a forced-bf16 run for coverage.
    M2, K2, N2 = 136, 640, 320
    k1, k2, k3 = jax.random.split(jax.random.PRNGKey(1), 3)
    bound2 = (6.0 / (K2 + N2)) ** 0.5
    w2 = jax.random.uniform(k2, (N2, K2), jnp.float32, -bound2, bound2)
    b2 = jax.random.uniform(k3, (N2,), jnp.float32, -0.5, 0.5)
    x2 = jax.random.normal(k1, (M2, K2), jnp.float32)
    ref2 = reference_linear_q(x2, w2, b2, bits=8)

    out2 = jax.block_until_ready(linear_q(x2, w2, b2, bits=8))
    assert out2.shape == (M2, N2)
    err2 = float(jnp.max(jnp.abs(out2 - ref2)))
    assert err2 < 2e-3, err2

    out2b = jax.block_until_ready(
        linear_q(x2, w2, b2, bits=8, operand_dtype=jnp.bfloat16))
    err2b = float(jnp.max(jnp.abs(out2b - ref2)))
    assert err2b < 2e-3, err2b

    # ---- Test 3: bits=32 (identity quantizers) exercises the f32 MXU path.
    out3 = jax.block_until_ready(linear_q(x1, w1, b1, bits=32))
    ref3 = reference_linear_q(x1, w1, b1, bits=32)
    err3 = float(jnp.max(jnp.abs(out3 - ref3)))
    assert err3 < 5e-2, err3     # loose: only validates the identity-quantizer path

    print("KERNEL_OK")
</pallas_src>

<mosaic_0001>
module attributes {stable_mosaic.version = 11 : i64} {
  func.func @_quantize_cast_kernel(%arg0: i32, %arg1: i32, %arg2: memref<16x128xf32, #tpu.memory_space<vmem>>, %arg3: memref<16x128xbf16, #tpu.memory_space<vmem>>) attributes {dimension_semantics = [#tpu.dimension_semantics<parallel>, #tpu.dimension_semantics<parallel>], iteration_bounds = array<i64: 1, 1>, scalar_prefetch = 0 : i64, scratch_operands = 0 : i64, tpu.core_type = #tpu.core_type<tc>, window_params = [{transform_indices = @transform_0, window_bounds = array<i64: 16, 128>}, {transform_indices = @transform_1, window_bounds = array<i64: 16, 128>}]} {
    %c0 = arith.constant 0 : index
    %c0_0 = arith.constant 0 : index
    %0 = vector.load %arg2[%c0, %c0_0] : memref<16x128xf32, #tpu.memory_space<vmem>>, vector<16x128xf32>
    %cst = arith.constant 3.200000e+01 : f32
    %1 = vector.broadcast %cst : f32 to vector<16x128xf32>
    %2 = arith.mulf %0, %1 : vector<16x128xf32>
    %3 = math.roundeven %2 : vector<16x128xf32>
    %cst_1 = arith.constant -1.280000e+02 : f32
    %cst_2 = arith.constant 1.270000e+02 : f32
    %4 = vector.broadcast %cst_1 : f32 to vector<16x128xf32>
    %5 = arith.maximumf %4, %3 : vector<16x128xf32>
    %6 = vector.broadcast %cst_2 : f32 to vector<16x128xf32>
    %7 = arith.minimumf %6, %5 : vector<16x128xf32>
    %cst_3 = arith.constant 3.125000e-02 : f32
    %8 = vector.broadcast %cst_3 : f32 to vector<16x128xf32>
    %9 = arith.mulf %7, %8 : vector<16x128xf32>
    %10 = arith.truncf %9 : vector<16x128xf32> to vector<16x128xbf16>
    %c0_4 = arith.constant 0 : index
    %c0_5 = arith.constant 0 : index
    %11 = vector.load %arg3[%c0_4, %c0_5] : memref<16x128xbf16, #tpu.memory_space<vmem>>, vector<16x128xbf16>
    tpu.vector_store %arg3[%c0_4, %c0_5], %10 {strides = array<i32>} : memref<16x128xbf16, #tpu.memory_space<vmem>>, vector<16x128xbf16>,
    return
  }
  func.func @transform_0(%arg0: i32, %arg1: i32) -> (i32, i32) {
    %c0_i32 = arith.constant 0 : i32
    return %arg0, %arg1 : i32, i32
  }
  func.func @transform_1(%arg0: i32, %arg1: i32) -> (i32, i32) {
    %c0_i32 = arith.constant 0 : i32
    return %arg0, %arg1 : i32, i32
  }
}

</mosaic_0001>

<bundles_post_ra>
// kernel: tpu_custom_call.1
= control target key start
LH: loop header
LB: loop body
LE: loop exit
PB: predicated region body
PF: predicated region fallthrough
CT: control target
= control target key end

     0   :  { %6 = vsyncpa [#allocation3], 0  ;;  %s167_s0 = inlined_call_operand.hbm [shape: f32[16,128], index: 0, kind: input, shape index: {}]   ;;  %s168_s1 = inlined_call_operand.hbm [shape: bf16[16,128], index: 1, kind: output, shape index: {}]  }
   0x1   :  { %7 = vsyncpa [#allocation4], 0  ;;  %s127_s6 = smov [#allocation2]   ;;  %s79_s10 = scalar_lea.hbm %s167_s0, 256 }
   0x2   :  { %s13_s7 = sshll.u32 %s127_s6, 4  ;;  %p80_p0 = scmp.ne.s32.totalorder %s167_s0, %s79_s10  ;;  %s14_s7 = int_to_ptr.vmem [resolvable:$true] %s13_s7 }
   0x3   :  { %p83_p1 = scmp.lt.u32.totalorder %s79_s10, %s167_s0 }
   0x5   :  { %p85_p2 = pnand %p83_p1, %p80_p0 }
   0x7   :  { %88 = shalt.err (!%p85_p2)
}
   0x8   :  { %s89_s15 = scalar_lea.vmem %s14_s7, 256  ;;  %p94_p4 = scmp.lt.s32.totalorder %s14_s7, %s14_s7 }
   0x9   :  { %p90_p3 = scmp.ne.s32.totalorder %s14_s7, %s89_s15  ;;  %p95_p5 = scmp.lt.s32.totalorder %s89_s15, %s89_s15 }
   0xb   :  { %p96_p6 = por %p95_p5, %p94_p4 }
   0xd   :  { %p97_p7 = pnand %p96_p6, %p90_p3 }
   0xf   :  { %100 = shalt.err (!%p97_p7)
}
  0x10   :  { %s128_s16 = smov 128   ;;  %s129_s17 = smov 8  }
  0x11   :  { %19 = dma.hbm_to_vmem [thread:$0]  %s167_s0, 256, %s14_s7, [#allocation3], %s128_s16, %s128_s16, %s129_s17  }
  0x12   :  { %123 = dma.done.wait [#allocation3], 256  }
  0x13   :  { %124 = vsyncadd [#allocation3], 4294967040  ;;  %v23_v0 = vld [vmem:[#allocation2] sm:$0xff]  ;;  %v24_v1 = vld [vmem:[#allocation2 + $0x8] sm:$0xff]  ;;  %s130_s20 = smov [#allocation5]  }
  0x14   :  { %v25_v2 = vmul.f32 32.0, %v23_v0  ;;  %v26_v3 = vmul.f32 32.0, %v24_v1  ;;  %s50_s21 = sshll.u32 %s130_s20, 4  ;;  %s51_s21 = int_to_ptr.vmem [resolvable:$true] %s50_s21 }
  0x15   :  { %s101_s0 = scalar_lea.vmem %s51_s21, 128  ;;  %p106_p9 = scmp.lt.s32.totalorder %s51_s21, %s51_s21 }
  0x16   :  { %v71_v4 = vround.rtne.f32 %v25_v2  ;;  %v72_v5 = vround.rtne.f32 %v26_v3  ;;  %p102_p8 = scmp.ne.s32.totalorder %s51_s21, %s101_s0  ;;  %p107_p10 = scmp.lt.s32.totalorder %s101_s0, %s101_s0 }
  0x18   :  { %v29_v6 = vmax.f32 %v71_v4, -128.0  ;;  %v30_v7 = vmax.f32 %v72_v5, -128.0  ;;  %p108_p11 = por %p107_p10, %p106_p9 }
  0x1a   :  { %v31_v8 = vmin.f32 %v29_v6, 127.0  ;;  %v32_v9 = vmin.f32 %v30_v7, 127.0  ;;  %p109_p12 = pnand %p108_p11, %p102_p8 }
  0x1c   :  { %v33_v10 = vmul.f32 0.03125, %v31_v8  ;;  %v34_v11 = vmul.f32 0.03125, %v32_v9 }
  0x1e   :  { %v69_v12 = vpack.c.bf16 %v34_v11, %v33_v10 }
  0x20   :  { %70 = vst [vmem:[#allocation5] sm:$0xff] %v69_v12  }
  0x21   :  { %112 = shalt.err (!%p109_p12)
}
  0x22   :  { %s113_s24 = scalar_lea.hbm %s168_s1, 128 }
  0x23   :  { %p114_p13 = scmp.ne.s32.totalorder %s168_s1, %s113_s24  ;;  %p117_p0 = scmp.lt.u32.totalorder %s113_s24, %s168_s1 }
  0x25   :  { %p119_p1 = pnand %p117_p0, %p114_p13 }
  0x27   :  { %122 = shalt.err (!%p119_p1)
}
  0x28   :  { %s131_s29 = smov 64   ;;  %s132_s30 = smov 4  }
  0x29   :  { %56 = dma.vmem_to_hbm [thread:$0]  %s51_s21, 128, %s168_s1, [#allocation4], %s131_s29, %s131_s29, %s132_s30  }
  0x2a   :  { %125 = dma.done.wait [#allocation4], 128  }
  0x2b   :  { %126 = vsyncadd [#allocation4], 4294967168 }
  0x2c   :  { %60 = vsyncpa [#allocation3], 1 }
  0x2d   :  { %61 = vsyncpa [#allocation4], 1 }

</bundles_post_ra>
